<compile_context>
chip_gen: v5e
topology: v5e:2x2
jax: 0.10.0
libtpu: 0.0.40
codegen_flags: <defaults>
</compile_context>

<pallas_src>
import functools

import jax
import jax.numpy as jnp
from jax import lax
from jax.experimental import pallas as pl
from jax.experimental.pallas import tpu as pltpu


def _round_up(x: int, m: int) -> int:
    return ((x + m - 1) // m) * m


def _sublane_min(dtype) -> int:
    # Minimum sublane multiple for dense vreg layouts:
    # 8 for 32-bit, 16 for 16-bit (bf16), 32 for 8-bit (int8/fp8).
    return {4: 8, 2: 16, 1: 32}.get(jnp.dtype(dtype).itemsize, 8)


def _gemm_kernel(a_ref, b_ref, o_ref, acc_ref, *, cast_dtype):
    """Computes one (tm, tn) output tile, accumulating over the K grid axis."""

    @pl.when(pl.program_id(2) == 0)
    def _init():
        acc_ref[...] = jnp.zeros_like(acc_ref)

    a = a_ref[...]
    b = b_ref[...]
    if cast_dtype is not None:  # static Python branch (bf16 MXU fast path)
        a = a.astype(cast_dtype)
        b = b.astype(cast_dtype)
    acc_ref[...] += jnp.dot(a, b, preferred_element_type=jnp.float32)

    @pl.when(pl.program_id(2) == pl.num_programs(2) - 1)
    def _store():
        o_ref[...] = acc_ref[...].astype(o_ref.dtype)


@functools.partial(jax.jit, static_argnames=("tm", "tn", "tk", "bf16_operands"))
def gemm(a: jax.Array, b: jax.Array, *, tm: int = 512, tn: int = 512,
         tk: int = 1024, bf16_operands: bool = False) -> jax.Array:
    """Computes a @ b with a tiled Pallas TPU kernel (f32 accumulation)."""
    M, K = a.shape
    K2, N = b.shape
    assert K == K2, "inner dimensions must match"

    out_dtype = jnp.promote_types(a.dtype, b.dtype)
    out_bytes = jnp.dtype(out_dtype).itemsize
    ab_bytes = max(jnp.dtype(a.dtype).itemsize, jnp.dtype(b.dtype).itemsize)
    sub_min = max(_sublane_min(a.dtype), _sublane_min(b.dtype))

    # --- K handling: zero-pad K up to a multiple of 128 only when needed and
    # pick tk so it divides the padded K exactly (every K block is full).
    Kp = _round_up(K, 128)
    tk = _round_up(min(tk, Kp), 128)
    while Kp % tk:
        tk -= 128

    # --- M/N: no padding except when a dim is below the hardware minimum
    # (sublane/lane); large unaligned dims use Pallas' masked edge blocks.
    Mp = max(M, sub_min)
    Np = max(N, 128)

    a_p = a if (Mp == M and Kp == K) else jnp.pad(a, ((0, Mp - M), (0, Kp - K)))
    b_p = b if (Kp == K and Np == N) else jnp.pad(b, ((0, Kp - K), (0, Np - N)))

    # Tile selection: full-extent block when the dim fits in one tile
    # (always a legal block shape), otherwise an aligned tile with a masked
    # partial edge block.
    tm = Mp if Mp <= tm else _round_up(tm, sub_min)
    tn = Np if Np <= tn else _round_up(tn, 128)

    # Megacore: make sure the parallel (M, N) axes expose >= 2 blocks when the
    # problem is big enough so both TensorCores (v7x) get work.
    if pl.cdiv(Mp, tm) * pl.cdiv(Np, tn) == 1:
        if Np >= 256:
            tn = _round_up(pl.cdiv(Np, 2), 128)
        elif Mp >= 2 * sub_min:
            tm = _round_up(pl.cdiv(Mp, 2), sub_min)

    # Keep the VMEM footprint (double-buffered A/B/out + f32 acc) under a
    # budget that is safe on every generation (v7x: 64 MiB per TensorCore).
    def _footprint(tm_, tn_, tk_):
        return (2 * tm_ * tk_ * ab_bytes + 2 * tk_ * tn_ * ab_bytes
                + tm_ * tn_ * 4 + 2 * tm_ * tn_ * out_bytes)

    VMEM_BUDGET = 44 << 20
    while _footprint(tm, tn, tk) > VMEM_BUDGET:
        if tk > 128:
            tk -= 128
            while Kp % tk:
                tk -= 128
        elif tn > 128:
            tn = max(128, _round_up(tn // 2, 128))
        elif tm > sub_min:
            tm = max(sub_min, _round_up(tm // 2, sub_min))
        else:
            break

    grid = (pl.cdiv(Mp, tm), pl.cdiv(Np, tn), Kp // tk)

    cost = pl.CostEstimate(
        flops=2 * M * N * K,
        transcendentals=0,
        bytes_accessed=(M * K + K * N) * ab_bytes + M * N * out_bytes,
    )
    # Raise v5e's 16 MiB default; never exceed 48 MiB (safe under v7x's 64 MiB).
    vmem_limit = min(48 << 20, max(32 << 20, _footprint(tm, tn, tk) + (8 << 20)))

    kernel = functools.partial(
        _gemm_kernel,
        cast_dtype=jnp.bfloat16 if bf16_operands else None,
    )

    out_p = pl.pallas_call(
        kernel,
        out_shape=jax.ShapeDtypeStruct((Mp, Np), out_dtype),
        grid_spec=pltpu.PrefetchScalarGridSpec(
            num_scalar_prefetch=0,
            grid=grid,
            in_specs=[
                pl.BlockSpec((tm, tk), lambda i, j, k: (i, k)),
                pl.BlockSpec((tk, tn), lambda i, j, k: (k, j)),
            ],
            out_specs=pl.BlockSpec((tm, tn), lambda i, j, k: (i, j)),
            scratch_shapes=[pltpu.VMEM((tm, tn), jnp.float32)],
        ),
        compiler_params=pltpu.CompilerParams(
            dimension_semantics=("parallel", "parallel", "arbitrary"),
            vmem_limit_bytes=vmem_limit,
        ),
        cost_estimate=cost,
    )(a_p, b_p)

    # Only tiny dims (< sublane/lane minimum) were padded; slice them back.
    if Mp == M and Np == N:
        return out_p
    return out_p[:M, :N]


if __name__ == "__main__":
    key = jax.random.PRNGKey(0)
    ka, kb, kc, kd = jax.random.split(key, 4)

    # Module spec: torch.randn(4, 4) for both operands.
    A = jax.random.normal(ka, (4, 4), dtype=jnp.float32)
    B = jax.random.normal(kb, (4, 4), dtype=jnp.float32)

    out = gemm(A, B)
    jax.block_until_ready(out)

    ref = jnp.matmul(A, B, precision=lax.Precision.HIGHEST)
    assert out.shape == ref.shape
    assert jnp.allclose(out, ref, atol=1e-4, rtol=1e-4), "mismatch (4x4)"

    # Multi-tile path: unaligned N -> masked partial edge block, no pad/slice.
    A2 = jax.random.normal(kc, (512, 384), dtype=jnp.float32)
    B2 = jax.random.normal(kd, (384, 640), dtype=jnp.float32)
    out2 = gemm(A2, B2)
    jax.block_until_ready(out2)
    ref2 = jnp.matmul(A2, B2, precision=lax.Precision.HIGHEST)
    assert jnp.allclose(out2, ref2, atol=1e-3, rtol=1e-3), "mismatch (tiled)"

    # bf16-operand fast path (v6e/v7x MXU rate), f32 accumulation.
    out3 = gemm(A2, B2, bf16_operands=True)
    jax.block_until_ready(out3)
    assert jnp.allclose(out3, ref2, atol=0.5, rtol=5e-2), "mismatch (bf16 path)"

    print("KERNEL_OK")
</pallas_src>

<mosaic_0001>
module attributes {stable_mosaic.version = 11 : i64} {
  func.func @_gemm_kernel(%arg0: i32, %arg1: i32, %arg2: i32, %arg3: memref<8x128xf32, #tpu.memory_space<vmem>>, %arg4: memref<128x128xf32, #tpu.memory_space<vmem>>, %arg5: memref<8x128xf32, #tpu.memory_space<vmem>>, %arg6: memref<8x128xf32, #tpu.memory_space<vmem>>) attributes {dimension_semantics = [#tpu.dimension_semantics<parallel>, #tpu.dimension_semantics<parallel>, #tpu.dimension_semantics<arbitrary>], iteration_bounds = array<i64: 1, 1, 1>, scalar_prefetch = 0 : i64, scratch_operands = 1 : i64, tpu.core_type = #tpu.core_type<tc>, window_params = [{transform_indices = @transform_0, window_bounds = array<i64: 8, 128>}, {transform_indices = @transform_1, window_bounds = array<i64: 128, 128>}, {transform_indices = @transform_2, window_bounds = array<i64: 8, 128>}]} {
    %c0_i32 = arith.constant 0 : i32
    %0 = arith.cmpi eq, %arg2, %c0_i32 : i32
    %1 = arith.extui %0 : i1 to i32
    %c0_i32_0 = arith.constant 0 : i32
    %2 = arith.cmpi ne, %1, %c0_i32_0 : i32
    scf.if %2 {
      %cst_10 = arith.constant 0.000000e+00 : f32
      %12 = vector.broadcast %cst_10 : f32 to vector<8x128xf32>
      %c0_11 = arith.constant 0 : index
      %c0_12 = arith.constant 0 : index
      %13 = vector.load %arg6[%c0_11, %c0_12] : memref<8x128xf32, #tpu.memory_space<vmem>>, vector<8x128xf32>
      tpu.vector_store %arg6[%c0_11, %c0_12], %12 {strides = array<i32>} : memref<8x128xf32, #tpu.memory_space<vmem>>, vector<8x128xf32>,
    } else {
    }
    %c0 = arith.constant 0 : index
    %c0_1 = arith.constant 0 : index
    %3 = vector.load %arg3[%c0, %c0_1] : memref<8x128xf32, #tpu.memory_space<vmem>>, vector<8x128xf32>
    %c0_2 = arith.constant 0 : index
    %c0_3 = arith.constant 0 : index
    %4 = vector.load %arg4[%c0_2, %c0_3] : memref<128x128xf32, #tpu.memory_space<vmem>>, vector<128x128xf32>
    %c0_4 = arith.constant 0 : index
    %c0_5 = arith.constant 0 : index
    %5 = vector.load %arg6[%c0_4, %c0_5] : memref<8x128xf32, #tpu.memory_space<vmem>>, vector<8x128xf32>
    %cst = arith.constant dense<0.000000e+00> : vector<8x128xf32>
    %6 = tpu.matmul %3, %4, %cst {dimension_numbers = #tpu.dot_dimension_numbers<[1], [0], [0], [1], [0, 0, 1, 1], [], []>} : vector<8x128xf32>, vector<128x128xf32>, vector<8x128xf32> -> vector<8x128xf32>
    %7 = arith.addf %5, %6 : vector<8x128xf32>
    %c0_6 = arith.constant 0 : index
    %c0_7 = arith.constant 0 : index
    %8 = vector.load %arg6[%c0_6, %c0_7] : memref<8x128xf32, #tpu.memory_space<vmem>>, vector<8x128xf32>
    tpu.vector_store %arg6[%c0_6, %c0_7], %7 {strides = array<i32>} : memref<8x128xf32, #tpu.memory_space<vmem>>, vector<8x128xf32>,
    %c0_i32_8 = arith.constant 0 : i32
    %9 = arith.cmpi eq, %arg2, %c0_i32_8 : i32
    %10 = arith.extui %9 : i1 to i32
    %c0_i32_9 = arith.constant 0 : i32
    %11 = arith.cmpi ne, %10, %c0_i32_9 : i32
    scf.if %11 {
      %c0_10 = arith.constant 0 : index
      %c0_11 = arith.constant 0 : index
      %12 = vector.load %arg6[%c0_10, %c0_11] : memref<8x128xf32, #tpu.memory_space<vmem>>, vector<8x128xf32>
      %c0_12 = arith.constant 0 : index
      %c0_13 = arith.constant 0 : index
      %13 = vector.load %arg5[%c0_12, %c0_13] : memref<8x128xf32, #tpu.memory_space<vmem>>, vector<8x128xf32>
      tpu.vector_store %arg5[%c0_12, %c0_13], %12 {strides = array<i32>} : memref<8x128xf32, #tpu.memory_space<vmem>>, vector<8x128xf32>,
    } else {
    }
    return
  }
  func.func @transform_0(%arg0: i32, %arg1: i32, %arg2: i32) -> (i32, i32) {
    %c0_i32 = arith.constant 0 : i32
    return %arg0, %arg2 : i32, i32
  }
  func.func @transform_1(%arg0: i32, %arg1: i32, %arg2: i32) -> (i32, i32) {
    %c0_i32 = arith.constant 0 : i32
    return %arg2, %arg1 : i32, i32
  }
  func.func @transform_2(%arg0: i32, %arg1: i32, %arg2: i32) -> (i32, i32) {
    %c0_i32 = arith.constant 0 : i32
    return %arg0, %arg1 : i32, i32
  }
}

</mosaic_0001>

<bundles_post_ra>
// kernel: gemm.1
= control target key start
LH: loop header
LB: loop body
LE: loop exit
PB: predicated region body
PF: predicated region fallthrough
CT: control target
= control target key end

     0   :  { %s134_s1 = inlined_call_operand.vmem [shape: f32[128,128], index: 1, kind: input, shape index: {}]   ;;  %s135_s0 = inlined_call_operand.vmem [shape: f32[8,128], index: 0, kind: input, shape index: {}]   ;;  %s136_s2 = inlined_call_operand.vmem [shape: f32[8,128], index: 2, kind: output, shape index: {}]  }
   0x1   :  { %v32_v0 = vld [vmem:[%s134_s1 + $0x78] sm:$0xff]  ;;  %v31_v1 = vld [vmem:[%s134_s1 + $0x70] sm:$0xff]  ;;  %v30_v2 = vld [vmem:[%s134_s1 + $0x68] sm:$0xff] }
   0x2   :  { %34 = vmatpush.msra.mxu0 %v32_v0  ;;  %v29_v3 = vld [vmem:[%s134_s1 + $0x60] sm:$0xff]  ;;  %v28_v4 = vld [vmem:[%s134_s1 + $0x58] sm:$0xff]  ;;  %v27_v5 = vld [vmem:[%s134_s1 + $0x50] sm:$0xff] }
   0x3   :  { %v26_v6 = vld [vmem:[%s134_s1 + $0x48] sm:$0xff]  ;;  %v25_v7 = vld [vmem:[%s134_s1 + $0x40] sm:$0xff]  ;;  %v24_v8 = vld [vmem:[%s134_s1 + $0x38] sm:$0xff] }
   0x4   :  { %35 = vmatpush.msra.mxu0 %v31_v1  ;;  %v23_v9 = vld [vmem:[%s134_s1 + $0x30] sm:$0xff]  ;;  %v22_v10 = vld [vmem:[%s134_s1 + $0x28] sm:$0xff]  ;;  %v21_v11 = vld [vmem:[%s134_s1 + $0x20] sm:$0xff] }
   0x5   :  { %v20_v12 = vld [vmem:[%s134_s1 + $0x18] sm:$0xff]  ;;  %v19_v13 = vld [vmem:[%s134_s1 + $0x10] sm:$0xff]  ;;  %v18_v14 = vld [vmem:[%s134_s1 + $0x8] sm:$0xff] }
   0x6   :  { %36 = vmatpush.msra.mxu0 %v30_v2  ;;  %v17_v15 = vld [vmem:[%s134_s1] sm:$0xff] }
   0x7   :  { %v16_v16 = vld [vmem:[%s135_s0] sm:$0xff] }
   0x8   :  { %37 = vmatpush.msra.mxu0 %v29_v3 }
   0xa   :  { %38 = vmatpush.msra.mxu0 %v28_v4 }
   0xc   :  { %39 = vmatpush.msra.mxu0 %v27_v5 }
   0xe   :  { %40 = vmatpush.msra.mxu0 %v26_v6 }
  0x10   :  { %41 = vmatpush.msra.mxu0 %v25_v7 }
  0x12   :  { %42 = vmatpush.msra.mxu0 %v24_v8 }
  0x14   :  { %43 = vmatpush.msra.mxu0 %v23_v9 }
  0x16   :  { %44 = vmatpush.msra.mxu0 %v22_v10 }
  0x18   :  { %45 = vmatpush.msra.mxu0 %v21_v11 }
  0x1a   :  { %46 = vmatpush.msra.mxu0 %v20_v12 }
  0x1c   :  { %47 = vmatpush.msra.mxu0 %v19_v13 }
  0x1e   :  { %48 = vmatpush.msra.mxu0 %v18_v14 }
  0x20   :  { %49 = vmatpush.msra.mxu0 %v17_v15 }
  0x21   :  { %50 = vmatmul.f32.vlgmr.msra.gmra.mxu0 %v16_v16 }
  0x9e   :  { %v51_v17 = vpop.f32.mrf.mxu0 }
  0x9f   :  { %60 = vst [vmem:[%s136_s2] sm:$0xff] %v51_v17 }

</bundles_post_ra>
